<compile_context>
chip_gen: v7x
topology: tpu7x:2x2x1
jax: 0.10.0
libtpu: 0.0.40
codegen_flags: <defaults>
</compile_context>

<pallas_src>
import jax
import jax.numpy as jnp
from jax.experimental import pallas as pl
from jax.experimental.pallas import tpu as pltpu


def _glu_kernel(x_ref, o_ref):
    # x_ref: (1, 2, tr, tl) tile; [:, 0] = values, [:, 1] = gates.
    # o_ref: (1, tr, tl)
    a = x_ref[0, 0]
    b = x_ref[0, 1]
    # sigmoid in the input dtype: exp goes to the EUP slot (free in a
    # mem-bound kernel); no bf16<->f32 cast chain on v6e/v7x.
    o_ref[0] = (a * jax.nn.sigmoid(b)).astype(o_ref.dtype)


def _largest_divisor(n, unit, cap):
    """Largest multiple of `unit` that divides n and is <= cap (0 if none)."""
    best = 0
    t = unit
    cap = min(cap, n)
    while t <= cap:
        if n % t == 0:
            best = t
        t += unit
    return best


def _pick_layout(M, itemsize, budget):
    """Factor the per-half slab M into (R, L) and pick a (tr, tl) block.

    Guarantees the (8, 128) BlockSpec rule: tl is a multiple of 128 or equals
    L; tr is a multiple of 8 or equals R.  One block holds BOTH halves, so the
    budget is interpreted as bytes for 2 * tr * tl elements.
    """
    sub_unit = max(8, 8 * (4 // itemsize))            # 8 f32, 16 bf16, 32 int8
    half_budget_elems = max(128, budget // (2 * itemsize))

    if M % 128 == 0:
        # Couple lane & sublane choices: aim for ~(sub_unit x L) ~ budget.
        lane_target = max(128, (half_budget_elems // sub_unit) // 128 * 128)
        L = 0
        if M % (sub_unit * 128) == 0:
            # Keep R = M // L a multiple of the packed sublane unit.
            L = _largest_divisor(M // sub_unit, 128, lane_target)
        if L == 0:
            L = _largest_divisor(M, 128, half_budget_elems)
        if L == 0:
            L = 128  # safety; unreachable since 128 | M
    else:
        # TODO(synk): nc*H*W has no multiple-of-128 factor; fall back to one
        # full-width row per half (legal: block dim equals the full dim).
        L = M
    R = M // L

    # Sublane-aligned row tile when possible, else the full extent (legal).
    row_cap = max(1, half_budget_elems // L)
    tr = (_largest_divisor(R, sub_unit, row_cap)
          or _largest_divisor(R, 8, row_cap)
          or R)

    # Lane tile (usually == L; only shrinks in pathological factorizations).
    col_cap = max(128, half_budget_elems // max(tr, 1))
    if L % 128 == 0:
        tl = _largest_divisor(L, 128, col_cap) or L
    else:
        tl = L
    return R, L, tr, tl


def glu_pallas(x, *, block_budget_bytes=2 * 1024 * 1024):
    """x: (N, C, H, W), C even. Returns x[:, :C//2] * sigmoid(x[:, C//2:])."""
    N, C, H, W = x.shape
    assert C % 2 == 0, "channels dont divide 2!"
    nc = C // 2
    M = nc * H * W
    itemsize = jnp.dtype(x.dtype).itemsize

    R, L, tr, tl = _pick_layout(M, itemsize, block_budget_bytes)

    # Free, contiguous view: (N, 2, R, L); half 0 = values, half 1 = gates.
    x_halves = x.reshape(N, 2, R, L)

    # Order the (all-parallel) grid axes by decreasing extent so the leading
    # axis Mosaic shards across TensorCores has >= 2 steps whenever possible.
    extents = {"n": N, "r": R // tr, "c": L // tl}
    order = sorted(extents, key=lambda k: -extents[k])
    grid = tuple(extents[k] for k in order)
    pos = {k: i for i, k in enumerate(order)}

    def in_map(*idx):
        return (idx[pos["n"]], 0, idx[pos["r"]], idx[pos["c"]])

    def out_map(*idx):
        return (idx[pos["n"]], idx[pos["r"]], idx[pos["c"]])

    total = N * M
    out_flat = pl.pallas_call(
        _glu_kernel,
        out_shape=jax.ShapeDtypeStruct((N, R, L), x.dtype),
        grid_spec=pltpu.PrefetchScalarGridSpec(
            num_scalar_prefetch=0,
            grid=grid,
            in_specs=[pl.BlockSpec((1, 2, tr, tl), in_map)],
            out_specs=pl.BlockSpec((1, tr, tl), out_map),
        ),
        compiler_params=pltpu.CompilerParams(
            dimension_semantics=("parallel",) * len(grid),
            vmem_limit_bytes=32 * 1024 * 1024,
        ),
        cost_estimate=pl.CostEstimate(
            flops=total,                          # one multiply per output
            transcendentals=total,                # one exp per gate element
            bytes_accessed=3 * total * itemsize,  # read both halves, write out
        ),
    )(x_halves)

    return out_flat.reshape(N, nc, H, W)


if __name__ == "__main__":
    key = jax.random.PRNGKey(0)
    # NCHW input consistent with the module's forward: batch=2, channels=4, 16x16
    x = jax.random.normal(key, (2, 4, 16, 16), dtype=jnp.float32)

    out = jax.block_until_ready(glu_pallas(x))

    # Pure-JAX reference check.
    nc = x.shape[1] // 2
    ref = x[:, :nc] * jax.nn.sigmoid(x[:, nc:])
    assert out.shape == (2, 2, 16, 16)
    assert jnp.allclose(out, ref, atol=1e-6, rtol=1e-6)

    print("KERNEL_OK")
</pallas_src>

<mosaic_0001>
module attributes {stable_mosaic.version = 11 : i64} {
  func.func @_glu_kernel(%arg0: i32, %arg1: i32, %arg2: i32, %arg3: memref<1x2x1x512xf32, #tpu.memory_space<vmem>>, %arg4: memref<1x1x512xf32, #tpu.memory_space<vmem>>) attributes {dimension_semantics = [#tpu.dimension_semantics<parallel>, #tpu.dimension_semantics<parallel>, #tpu.dimension_semantics<parallel>], iteration_bounds = array<i64: 2, 1, 1>, scalar_prefetch = 0 : i64, scratch_operands = 0 : i64, tpu.core_type = #tpu.core_type<tc>, window_params = [{transform_indices = @transform_0, window_bounds = array<i64: 1, 2, 1, 512>}, {transform_indices = @transform_1, window_bounds = array<i64: 1, 1, 512>}]} {
    %c0 = arith.constant 0 : index
    %c0_0 = arith.constant 0 : index
    %c0_1 = arith.constant 0 : index
    %c0_2 = arith.constant 0 : index
    %0 = vector.load %arg3[%c0, %c0_0, %c0_1, %c0_2] : memref<1x2x1x512xf32, #tpu.memory_space<vmem>>, vector<1x1x1x512xf32>
    %1 = vector.shape_cast %0 : vector<1x1x1x512xf32> to vector<1x512xf32>
    %c0_3 = arith.constant 0 : index
    %c1 = arith.constant 1 : index
    %c0_4 = arith.constant 0 : index
    %c0_5 = arith.constant 0 : index
    %2 = vector.load %arg3[%c0_3, %c1, %c0_4, %c0_5] : memref<1x2x1x512xf32, #tpu.memory_space<vmem>>, vector<1x1x1x512xf32>
    %3 = vector.shape_cast %2 : vector<1x1x1x512xf32> to vector<1x512xf32>
    %4 = arith.negf %3 : vector<1x512xf32>
    %5 = math.exp %4 : vector<1x512xf32>
    %cst = arith.constant 1.000000e+00 : f32
    %6 = vector.broadcast %cst : f32 to vector<1x512xf32>
    %7 = arith.addf %6, %5 : vector<1x512xf32>
    %8 = arith.divf %6, %7 : vector<1x512xf32>
    %9 = arith.mulf %1, %8 : vector<1x512xf32>
    %c0_6 = arith.constant 0 : index
    %c0_7 = arith.constant 0 : index
    %c0_8 = arith.constant 0 : index
    %10 = vector.load %arg4[%c0_6, %c0_7, %c0_8] : memref<1x1x512xf32, #tpu.memory_space<vmem>>, vector<1x1x512xf32>
    %11 = vector.shape_cast %10 : vector<1x1x512xf32> to vector<1x512xf32>
    %12 = vector.shape_cast %9 : vector<1x512xf32> to vector<1x1x512xf32>
    tpu.vector_store %arg4[%c0_6, %c0_7, %c0_8], %12 {strides = array<i32>} : memref<1x1x512xf32, #tpu.memory_space<vmem>>, vector<1x1x512xf32>,
    return
  }
  func.func @transform_0(%arg0: i32, %arg1: i32, %arg2: i32) -> (i32, i32, i32, i32) {
    %c0_i32 = arith.constant 0 : i32
    %c0_i32_0 = arith.constant 0 : i32
    return %arg0, %c0_i32, %arg1, %arg2 : i32, i32, i32, i32
  }
  func.func @transform_1(%arg0: i32, %arg1: i32, %arg2: i32) -> (i32, i32, i32) {
    %c0_i32 = arith.constant 0 : i32
    return %arg0, %arg1, %arg2 : i32, i32, i32
  }
}

</mosaic_0001>

<bundles_post_ra>
// kernel: tpu_custom_call.1
= control target key start
LH: loop header
LB: loop body
LE: loop exit
PB: predicated region body
PF: predicated region fallthrough
CT: control target
= control target key end

     0   :  { %6 = vsyncpa [#allocation3], 0  ;;  %s682_s0 = inlined_call_operand.hbm [shape: f32[2,2,1,512], index: 0, kind: input, shape index: {}]   ;;  %s683_s1 = inlined_call_operand.hbm [shape: f32[2,1,512], index: 1, kind: output, shape index: {}]  }
   0x1   :  { %8 = vsyncpa [#allocation3 + $0x1], 0 }
   0x2   :  { %9 = vsyncpa [#allocation4], 0 }
   0x3   :  { %11 = vsyncpa [#allocation4 + $0x1], 0  ;;  %s508_s6 = smov 0   ;;  %s510_s7 = smov 0  }
   0x4   :  { %s512_s8 = smov 0   ;;  %s514_s9 = smov 0  }
   0x5   :  { %s516_s10 = smov 0   ;;  %s518_s11 = smov 0  }
   0x6 LB: > { %s293_s12 = sadd.s32 4294967295, %s492_s11   ;;  %s294_s13 = sadd.s32 4294967294, %s492_s11   ;;  %s492_s11 = sphi %s518_s11, %s17_s11   ;;  %s488_s10 = sphi %s516_s10, %s698_s10   ;;  %s484_s9 = sphi %s514_s9, %s697_s9   ;;  %s480_s8 = sphi %s512_s8, %s696_s8   ;;  %s476_s7 = sphi %s510_s7, %s695_s7   ;;  %s472_s6 = sphi %s508_s6, %s694_s6  }
   0x7   : > { %s36_s14 = sadd.s32 1, %s488_s10  ;;  %s47_s15 = sadd.s32 1, %s480_s8 }
   0x8   : > { %p38_p0 = scmp.ge.s32.totalorder %s36_s14, 2  ;;  %p54_p1 = scmp.ne.s32.totalorder %s480_s8, %s476_s7 }
   0x9   : > { %p55_p2 = scmp.eq.s32.totalorder %s492_s11, 0  ;;  %p60_p3 = scmp.ne.s32.totalorder %s476_s7, %s472_s6 }
   0xa   : > { %s700_s14 = smov (%p38_p0, %s36_s14), 0  ;;  %p61_p5 = scmp.eq.s32.totalorder %s293_s12, 0 }
   0xb   : > { %p549_p4 = por %p55_p2, %p54_p1  ;;  %s40_s17 = ssub.s32 %s488_s10, %s700_s14 }
   0xc   : > { %p88_p6 = scmp.eq.s32.totalorder %s293_s12, 1  ;;  %p45_p7 = scmp.eq.s32.totalorder %s40_s17, 0 }
   0xd   : > { %p555_p8 = por %p61_p5, %p60_p3  ;;  %p94_p10 = scmp.eq.s32.totalorder %s294_s13, 1 }
   0xe   : > { %p559_p9 = por %p88_p6, %p54_p1  ;;  %p324_p13 = scmp.lt.s32.totalorder %s492_s11, 2 }
   0xf   : > { %s564_s20 = scalar_select %p45_p7, %s480_s8, %s47_s15  }
  0x10   : > { %s687_s19 = scalar_select %p559_p9, 1, 0 }
  0x11   : > { %p566_p11 = por %p94_p10, %p60_p3  ;;  %s114_s22 = sand.u32 1, %s480_s8  }
  0x12   : > { %s297_s23 = sshll.u32 %s114_s22, 3  ;;  %s310_s24 = sshll.u32 %s488_s10, 7 }
  0x13   : > { %s688_s21 = scalar_select %p566_p11, 1, 0 }
  0x14   : > { %s577_s27 = scalar_lea.hbm %s682_s0, %s310_s24  ;;  %s118_s28 = scalar_lea.vmem [#allocation2], %s297_s23 }
  0x15   : > { %s129_s29 = sshll.u32 %s118_s28, 4  ;;  %p583_p0 = pnand %p324_p13, %p549_p4  ;;  %s579_s29 = int_to_ptr.vmem [resolvable:$true] %s129_s29 }
  0x16   : > { %s588_s2 = scalar_lea.sflag [#allocation3], %s114_s22  ;;  %s380_s3 = scalar_lea.hbm %s577_s27, 128 }
  0x17   : > { %p381_p2 = scmp.ne.s32.totalorder %s577_s27, %s380_s3  ;;  %p382_p3 = pneg %p583_p0 }
  0x18   : > { %s385_s12 = scalar_lea.hbm %s682_s0, 256  ;;  %p386_p4 = scmp.lt.u32.totalorder %s577_s27, %s682_s0 }
  0x19   : > { %p383_p5 = pnand %p382_p3, %p381_p2  ;;  %p387_p7 = scmp.lt.u32.totalorder %s385_s12, %s380_s3 }
  0x1a   : > { %p389_p13 = scmp.lt.u32.totalorder %s380_s3, %s577_s27 }
  0x1b   : > { %p384_p6 = pneg %p383_p5  ;;  %p388_p10 = por %p387_p7, %p386_p4 }
  0x1d   : > { %p390_p12 = por %p389_p13, %p388_p10 }
  0x1f   : > { %p391_p1 = pnand %p390_p12, %p384_p6 }
  0x21   : > { %394 = shalt.err (!%p391_p1)
}
  0x22   : > { %s395_s16 = scalar_lea.vmem %s579_s29, 128  ;;  %s494_s17 = smov [#allocation2]  }
  0x23   : > { %p396_p2 = scmp.ne.s32.totalorder %s579_s29, %s395_s16  ;;  %s400_s22 = sshll.u32 %s494_s17, 4  ;;  %s401_s22 = int_to_ptr.vmem [resolvable:$false] %s400_s22 }
  0x24   : > { %s402_s23 = scalar_lea.vmem %s401_s22, 256  ;;  %p403_p9 = scmp.lt.s32.totalorder %s579_s29, %s401_s22 }
  0x25   : > { %p398_p5 = pnand %p396_p2, %p382_p3  ;;  %p404_p4 = scmp.lt.s32.totalorder %s402_s23, %s395_s16 }
  0x27   : > { %p399_p11 = pneg %p398_p5  ;;  %p405_p7 = por %p404_p4, %p403_p9 }
  0x29   : > { %p406_p10 = pnand %p405_p7, %p399_p11 }
  0x2b   : > { %409 = shalt.err (!%p406_p10)
}
  0x2c   : > { %s495_s24 = smov 64   ;;  %s496_s25 = smov 4  }
  0x2d   : > { %319 = dma.hbm_to_vmem [thread:$0]  (!%p583_p0), %s577_s27, 128, %s579_s29, %s588_s2, %s495_s24, %s495_s24, %s496_s25  }
  0x2e   : > { %p137_p12 = scmp.lt.s32.totalorder %s492_s11, 3  ;;  %p690_p1 = scmp.ge.s32.totalorder %s492_s11, 1 }
  0x30   : > { %p138_p3 = pnand %p690_p1, %p137_p12 }
  0x31   : > { %s620_s26 = sand.u32 (!%p138_p3), 1, %s476_s7  }
  0x32   : > { %141 = sbr.rel (%p138_p3) target bundleno = 101 (0x65), region = 24  ;;  %s301_s28 = sshll.u32 (!%p138_p3), %s620_s26, 3 }
  0x33   : > { %s144_s3 = scalar_lea.sflag (!%p138_p3), [#allocation3], %s620_s26  ;;  %s147_s4 = scalar_lea.vmem (!%p138_p3), [#allocation2], %s301_s28 }
  0x39   : > { %463 = dma.done.wait (%p555_p8), %s144_s3, 128  }
  0x3a   : > { %465 = vsyncadd (%p555_p8), %s144_s3, 4294967168  ;;  %v303_v0 = vld [vmem:[%s147_s4 + $0x4] sm:$0xf]  ;;  %s302_s27 = sshll.u32 %s620_s26, 2  ;;  %v178_v4 = vlaneseq  ;;  %v168_v5 = vld [vmem:[%s147_s4] sm:$0xf] }
  0x3b   : > { %v304_v1 = vmul.f32 -1.442695, %v303_v0  ;;  %s165_s29 = scalar_lea.vmem [#allocation5], %s302_s27  ;;  %s311_s2 = sshll.u32 %s484_s9, 6 }
  0x3c   : > { %s202_s30 = sshll.u32 %s165_s29, 4  ;;  %vm180_vm0 = vcmp.lt.s32.totalorder %v178_v4, 512  ;;  %s635_s12 = scalar_lea.hbm %s683_s1, %s311_s2  ;;  %s630_s30 = int_to_ptr.vmem [resolvable:$true] %s202_s30 }
  0x3d   : > { %376 = vpow2.f32 %v304_v1  ;;  %s184_s13 = scalar_lea.sflag [#allocation4], %s620_s26  ;;  %s410_s15 = scalar_lea.vmem %s630_s30, 64 }
  0x3e   : > { %p411_p8 = scmp.ne.s32.totalorder %s630_s30, %s410_s15  ;;  %p691_p9 = scmp.ne.s32.totalorder %s687_s19, 0 }
  0x3f   : > { %s497_s9 = smov [#allocation5]  }
  0x40   : > { %p412_p11 = pnand %p411_p8, %p691_p9  ;;  %s414_s16 = sshll.u32 %s497_s9, 4  ;;  %s415_s16 = int_to_ptr.vmem [resolvable:$false] %s414_s16 }
  0x41   : > { %s416_s17 = scalar_lea.vmem %s415_s16, 128  ;;  %p417_p6 = scmp.lt.s32.totalorder %s630_s30, %s415_s16 }
  0x42   : > { %p413_p0 = pneg %p412_p11  ;;  %p418_p13 = scmp.lt.s32.totalorder %s416_s17, %s410_s15 }
  0x44   : > { %p419_p2 = por %p418_p13, %p417_p6 }
  0x46   : > { %p420_p5 = pnand %p419_p2, %p413_p0 }
  0x47   : > { %v377_v2 = vpop.eup %376 }
  0x48   : > { %v174_v3 = vadd.f32 1.0, %v377_v2 }
  0x4a   : > { %378 = vrcp.f32 %v174_v3 }
  0x54   : > { %v379_v6 = vpop.eup %378 }
  0x55   : > { %v177_v7 = vmul.f32 %v379_v6, %v168_v5 }
  0x57   : > { %182 = vst.msk [vmem:[%s165_s29] sm:$0xf] %vm180_vm0, %v177_v7 }
  0x58   : > { %423 = shalt.err (!%p420_p5)
}
  0x59   : > { %s424_s22 = scalar_lea.hbm %s635_s12, 64  ;;  %s428_s25 = scalar_lea.hbm %s683_s1, 128 }
  0x5a   : > { %p425_p4 = scmp.ne.s32.totalorder %s635_s12, %s424_s22  ;;  %p429_p12 = scmp.lt.u32.totalorder %s635_s12, %s683_s1 }
  0x5b   : > { %p430_p1 = scmp.lt.u32.totalorder %s428_s25, %s424_s22  ;;  %p432_p8 = scmp.lt.u32.totalorder %s424_s22, %s635_s12 }
  0x5c   : > { %p426_p7 = pnand %p425_p4, %p691_p9 }
  0x5d   : > { %p431_p3 = por %p430_p1, %p429_p12 }
  0x5e   : > { %p427_p10 = pneg %p426_p7 }
  0x5f   : > { %p433_p11 = por %p432_p8, %p431_p3 }
  0x61   : > { %p434_p0 = pnand %p433_p11, %p427_p10 }
  0x63   : > { %437 = shalt.err (!%p434_p0)
}
  0x64   : > { %314 = dma.vmem_to_hbm [thread:$0]  (%p691_p9), %s630_s30, 64, %s635_s12, %s184_s13  }
  0x65 PF: > { %s214_s3 = sand.u32 1, %s472_s6   ;;  %p692_p6 = scmp.ne.s32.totalorder %s688_s21, 0 }
  0x66   : > { %p693_p13 = scmp.ge.s32.totalorder %s492_s11, 2  ;;  %s215_s4 = scalar_lea.sflag [#allocation4], %s214_s3 }
  0x68   : > { %p321_p2 = pnand %p693_p13, %p692_p6 }
  0x6a   : > { %467 = dma.done.wait (!%p321_p2), %s215_s4, 64  }
  0x6b   : > { %469 = vsyncadd (!%p321_p2), %s215_s4, 4294967232  ;;  %s17_s11 = sadd.s32 1, %s492_s11   ;;  %s694_s6 = smov %s476_s7 }
  0x6c   : > { %p14_p5 = scmp.ge.s32.totalorder %s17_s11, 4   ;;  %s695_s7 = smov %s480_s8 }
  0x6d   : > { %s696_s8 = smov %s564_s20  ;;  %s697_s9 = smov %s488_s10 }
  0x6e   : > { %s698_s10 = smov %s700_s14  ;;  %16 = sbr.rel (!%p14_p5) target bundleno = 6 (0x6), region = 70 }
  0x75   :  { %220 = vsyncpa [#allocation3], 1 }
  0x76   :  { %222 = vsyncpa [#allocation3 + $0x1], 1 }
  0x77   :  { %223 = vsyncpa [#allocation4], 1 }
  0x78   :  { %225 = vsyncpa [#allocation4 + $0x1], 1 }

</bundles_post_ra>
